<compile_context>
chip_gen: v6e
topology: v6e:2x2x1
jax: 0.10.0
libtpu: 0.0.40
codegen_flags: <defaults>
</compile_context>

<pallas_src>
import functools

import jax
import jax.numpy as jnp
from jax import lax
from jax.experimental import pallas as pl
from jax.experimental.pallas import tpu as pltpu


NEG_SLOPE = 0.01     # nn.LeakyReLU() default negative_slope
LANE = 128           # TPU lane width


def _round_up(x, m):
    return ((x + m - 1) // m) * m


def _pick_spatial_tile(p, target=512):
    """Pick TM (multiple of 128, <= target) and padded spatial extent P_pad.

    Among candidate tiles whose padded extent is within ~12.5% of the minimum achievable
    padding, take the largest tile (bigger MXU M, fewer ~0.35us grid-step overheads).
    Works for any P (ragged tails are handled by padding, never by toh=1 degradation).
    """
    hi = max(LANE, min(target, _round_up(p, LANE)))
    cands = [(tm, _round_up(p, tm)) for tm in range(LANE, hi + 1, LANE)]
    min_pad = min(pp for _, pp in cands)
    thresh = (min_pad * 9) // 8
    tm = max(t for t, pp in cands if pp <= thresh)
    return tm, _round_up(p, tm)


def _vmem_limit_bytes():
    # Generation-aware scoped-VMEM budget.  The per-step working set here is ~100 KB, so
    # this is just a safe portable cap: <= half of physical VMEM, never above 64 MiB
    # (v5e/v6e: 128 MiB physical -> 64 MiB; v7x: 64 MiB physical -> 32 MiB).
    cap = 64 * 1024 * 1024
    try:
        cap = int(getattr(pltpu.get_tpu_info(), "vmem_capacity_bytes", cap))
    except Exception:
        pass
    return min(cap // 2, 64 * 1024 * 1024)


def _make_conv_bn_lrelu_kernel(neg_slope):
    """Fused kernel: one (Cout, K) @ (K, TM) matmul + BN shift + LeakyReLU per grid step."""

    def kernel(x_ref, w_ref, shift_ref, o_ref):
        # x_ref:     (K, TM)    bf16 -- K-major im2col tile (spatial on lanes, dense)
        # w_ref:     (Cout, K)  bf16 -- BN-scale-folded weights, resident in VMEM
        # shift_ref: (Cout, 1)  f32  -- BN shift (beta - mean*scale), per-sublane broadcast
        # o_ref:     (Cout, TM) f32  -- output tile, spatial on lanes (lane-dense stores)
        acc = jnp.dot(w_ref[...], x_ref[...], preferred_element_type=jnp.float32)
        y = acc + shift_ref[...]
        o_ref[...] = jnp.where(y > 0, y, neg_slope * y).astype(o_ref.dtype)

    return kernel


@functools.partial(jax.jit,
                   static_argnames=("kernel_size", "stride", "padding", "training"))
def conv_block_forward(x_nchw, w_oihw, gamma, beta, run_mean, run_var,
                       kernel_size=(3, 3), stride=(1, 1), padding=(1, 1),
                       eps=1e-5, training=False):
    if training:
        # TODO(synk): training-mode Dropout(0.3) masking/scaling and batch-statistics
        # BatchNorm are not implemented; this kernel matches .eval() semantics
        # (Dropout = identity, BN uses running statistics).
        raise NotImplementedError("Conv_Block Pallas kernel implements eval() mode only")

    kh, kw = kernel_size
    sh, sw = stride
    ph, pw = padding
    N, Cin, H, W = x_nchw.shape
    Cout = w_oihw.shape[0]
    assert w_oihw.shape[1] == Cin

    OH = (H + 2 * ph - kh) // sh + 1
    OW = (W + 2 * pw - kw) // sw + 1
    P = OH * OW
    K = kh * kw * Cin

    # ---- glue (plain JAX): BN folding + K-major im2col pre-pack ------------------------
    scale = (gamma / jnp.sqrt(run_var + eps)).astype(jnp.float32)            # (Cout,)
    shift = (beta - run_mean * scale).astype(jnp.float32).reshape(Cout, 1)   # (Cout, 1)

    # Fold BN scale into the conv weight; reorder to (Cout, kh*kw*Cin) with (kh, kw, Cin)
    # flattening order; bf16 for the MXU.
    w_fold = w_oihw.astype(jnp.float32) * scale[:, None, None, None]         # (O, I, kh, kw)
    w2 = jnp.transpose(w_fold, (0, 2, 3, 1)).reshape(Cout, K).astype(jnp.bfloat16)

    # K-major im2col: xcol[n, (i,j,c), oh*OW+ow] = x_pad[n, c, oh*sh + i, ow*sw + j].
    # Stored bf16 (halves pre-pack HBM traffic); written once by XLA, read once by the
    # kernel.  This puts the spatial axis on the lanes and turns the conv into one big-K
    # contraction even for tiny Cin.  Stride>1 and odd widths are absorbed here so the
    # kernel never issues strided/dynamic slices.
    # For large Cin (K per tap >= 128) an in-kernel window assembly would avoid the kh*kw
    # HBM amplification of this pre-pack; unnecessary at these channel counts.
    xpad = jnp.pad(x_nchw.astype(jnp.bfloat16),
                   ((0, 0), (0, 0), (ph, ph), (pw, pw)))                     # (N, Cin, Hp, Wp)
    taps = []
    for i in range(kh):
        for j in range(kw):
            taps.append(lax.slice(
                xpad, (0, 0, i, j),
                (N, Cin, i + (OH - 1) * sh + 1, j + (OW - 1) * sw + 1),
                (1, 1, sh, sw)))                                             # (N, Cin, OH, OW)
    xcol = jnp.stack(taps, axis=1).reshape(N, K, P)                          # (N, K, P)

    # Spatial tiling: TM output pixels (multiple of 128) per grid step; pad P if ragged.
    TM, P_pad = _pick_spatial_tile(P)
    if P_pad != P:
        xcol = jnp.pad(xcol, ((0, 0), (0, 0), (0, P_pad - P)))

    # ---- hot path: fused matmul + BN shift + LeakyReLU ---------------------------------
    kernel = _make_conv_bn_lrelu_kernel(NEG_SLOPE)
    grid = (N, P_pad // TM)

    out3 = pl.pallas_call(
        kernel,
        out_shape=jax.ShapeDtypeStruct((N, Cout, P_pad), jnp.float32),
        grid_spec=pltpu.PrefetchScalarGridSpec(
            num_scalar_prefetch=0,
            grid=grid,
            in_specs=[
                pl.BlockSpec((None, K, TM), lambda n, m: (n, 0, m)),   # im2col tile
                pl.BlockSpec((Cout, K), lambda n, m: (0, 0)),          # weights (resident)
                pl.BlockSpec((Cout, 1), lambda n, m: (0, 0)),          # BN shift (resident)
            ],
            out_specs=pl.BlockSpec((None, Cout, TM), lambda n, m: (n, 0, m)),
        ),
        compiler_params=pltpu.CompilerParams(
            # Both grid axes are fully independent (no cross-step accumulation); "parallel"
            # lets the compiler shard them across TensorCores on multi-core parts (v7x)
            # and is a no-op on single-core v5e/v6e.  (pltpu.CORE_PARALLEL is the explicit
            # v7x spelling but is not portable across all generations, so we keep this.)
            dimension_semantics=("parallel", "parallel"),
            vmem_limit_bytes=_vmem_limit_bytes(),
        ),
    )(xcol, w2, shift)

    if P_pad != P:
        out3 = out3[:, :, :P]
    # Kernel already produced the N, C, (H*W) layout -> this reshape is free (no transpose pass).
    return out3.reshape(N, Cout, OH, OW)


# ----------------------------- references -----------------------------------------------

def _reference_f32(x_nchw, w_oihw, gamma, beta, run_mean, run_var,
                   stride, padding, eps=1e-5):
    """Full-f32 equivalent of the PyTorch module (eval mode)."""
    y = lax.conv_general_dilated(
        x_nchw.astype(jnp.float32), w_oihw.astype(jnp.float32),
        window_strides=stride,
        padding=[(padding[0], padding[0]), (padding[1], padding[1])],
        dimension_numbers=("NCHW", "OIHW", "NCHW"),
        precision=lax.Precision.HIGHEST)
    scale = gamma / jnp.sqrt(run_var + eps)
    shift = beta - run_mean * scale
    y = y * scale[None, :, None, None] + shift[None, :, None, None]
    return jnp.where(y > 0, y, NEG_SLOPE * y)


def _reference_bf16_operands(x_nchw, w_oihw, gamma, beta, run_mean, run_var,
                             stride, padding, eps=1e-5):
    """Mirrors the kernel numerics: BN scale folded into the weight, operands rounded
    to bf16, accumulation in f32 (documented contract: bf16-operand conv)."""
    scale = gamma / jnp.sqrt(run_var + eps)
    shift = beta - run_mean * scale
    w_fold = (w_oihw.astype(jnp.float32) * scale[:, None, None, None]
              ).astype(jnp.bfloat16).astype(jnp.float32)
    x32 = x_nchw.astype(jnp.bfloat16).astype(jnp.float32)
    y = lax.conv_general_dilated(
        x32, w_fold, window_strides=stride,
        padding=[(padding[0], padding[0]), (padding[1], padding[1])],
        dimension_numbers=("NCHW", "OIHW", "NCHW"),
        precision=lax.Precision.HIGHEST)
    y = y + shift[None, :, None, None]
    return jnp.where(y > 0, y, NEG_SLOPE * y)


def _run_case(key, N, Cin, H, W, Cout, kernel_size, stride, padding):
    kx, kwt, kg, kb, km, kv = jax.random.split(key, 6)
    x = jax.random.normal(kx, (N, Cin, H, W), dtype=jnp.float32)
    w = 0.1 * jax.random.normal(kwt, (Cout, Cin, *kernel_size), dtype=jnp.float32)
    gamma = 1.0 + 0.1 * jax.random.normal(kg, (Cout,), dtype=jnp.float32)
    beta = 0.1 * jax.random.normal(kb, (Cout,), dtype=jnp.float32)
    run_mean = 0.1 * jax.random.normal(km, (Cout,), dtype=jnp.float32)
    run_var = jnp.abs(1.0 + 0.1 * jax.random.normal(kv, (Cout,), dtype=jnp.float32))

    out = conv_block_forward(x, w, gamma, beta, run_mean, run_var,
                             kernel_size=kernel_size, stride=stride, padding=padding)
    out = jax.block_until_ready(out)

    OH = (H + 2 * padding[0] - kernel_size[0]) // stride[0] + 1
    OW = (W + 2 * padding[1] - kernel_size[1]) // stride[1] + 1
    assert out.shape == (N, Cout, OH, OW), out.shape

    # Tight check against a reference with identical (bf16-operand) numerics.
    ref_bf16 = _reference_bf16_operands(x, w, gamma, beta, run_mean, run_var,
                                        stride, padding)
    assert jnp.allclose(out, ref_bf16, rtol=1e-3, atol=1e-3), (
        "mismatch vs bf16-operand reference, max err "
        f"{jnp.max(jnp.abs(out - ref_bf16)):.3e}")

    # Loose check against the full-f32 module math (difference is bf16 rounding only).
    ref_f32 = _reference_f32(x, w, gamma, beta, run_mean, run_var, stride, padding)
    assert jnp.allclose(out, ref_f32, rtol=5e-2, atol=5e-2), (
        "mismatch vs f32 reference, max err "
        f"{jnp.max(jnp.abs(out - ref_f32)):.3e}")


if __name__ == "__main__":
    key = jax.random.PRNGKey(0)
    k1, k2 = jax.random.split(key)

    # Case 1: the spec's small shape (stride 1, "same"-style padding).
    _run_case(k1, N=2, Cin=4, H=16, W=16, Cout=8,
              kernel_size=(3, 3), stride=(1, 1), padding=(1, 1))

    # Case 2: ragged/odd shapes + stride 2 (exercises padding of OH*OW and odd K).
    _run_case(k2, N=1, Cin=3, H=15, W=13, Cout=8,
              kernel_size=(3, 3), stride=(2, 2), padding=(1, 1))

    print("KERNEL_OK")
</pallas_src>

<mosaic_0001>
module attributes {stable_mosaic.version = 11 : i64} {
  func.func @kernel(%arg0: i32, %arg1: i32, %arg2: memref<1x36x256xbf16, #tpu.memory_space<vmem>>, %arg3: memref<8x36xbf16, #tpu.memory_space<vmem>>, %arg4: memref<8x1xf32, #tpu.memory_space<vmem>>, %arg5: memref<1x8x256xf32, #tpu.memory_space<vmem>>) attributes {dimension_semantics = [#tpu.dimension_semantics<parallel>, #tpu.dimension_semantics<parallel>], iteration_bounds = array<i64: 2, 1>, scalar_prefetch = 0 : i64, scratch_operands = 0 : i64, tpu.core_type = #tpu.core_type<tc>, window_params = [{transform_indices = @transform_0, window_bounds = array<i64: 1, 36, 256>}, {pipeline_mode = #tpu.pipeline_mode<synchronous>, transform_indices = @transform_1, window_bounds = array<i64: 8, 36>}, {pipeline_mode = #tpu.pipeline_mode<synchronous>, transform_indices = @transform_2, window_bounds = array<i64: 8, 1>}, {transform_indices = @transform_3, window_bounds = array<i64: 1, 8, 256>}]} {
    %c0 = arith.constant 0 : index
    %c0_0 = arith.constant 0 : index
    %0 = vector.load %arg3[%c0, %c0_0] : memref<8x36xbf16, #tpu.memory_space<vmem>>, vector<8x36xbf16>
    %c0_1 = arith.constant 0 : index
    %c0_2 = arith.constant 0 : index
    %c0_3 = arith.constant 0 : index
    %1 = vector.load %arg2[%c0_1, %c0_2, %c0_3] : memref<1x36x256xbf16, #tpu.memory_space<vmem>>, vector<1x36x256xbf16>
    %2 = vector.shape_cast %1 : vector<1x36x256xbf16> to vector<36x256xbf16>
    %cst = arith.constant dense<0.000000e+00> : vector<8x256xf32>
    %3 = tpu.matmul %0, %2, %cst {dimension_numbers = #tpu.dot_dimension_numbers<[1], [0], [0], [1], [0, 0, 1, 1], [], []>} : vector<8x36xbf16>, vector<36x256xbf16>, vector<8x256xf32> -> vector<8x256xf32>
    %c0_4 = arith.constant 0 : index
    %c0_5 = arith.constant 0 : index
    %4 = vector.load %arg4[%c0_4, %c0_5] : memref<8x1xf32, #tpu.memory_space<vmem>>, vector<8x1xf32>
    %5 = vector.broadcast %4 : vector<8x1xf32> to vector<8x256xf32>
    %6 = arith.addf %3, %5 : vector<8x256xf32>
    %cst_6 = arith.constant 0.000000e+00 : f32
    %7 = vector.broadcast %cst_6 : f32 to vector<8x256xf32>
    %8 = arith.cmpf ogt, %6, %7 : vector<8x256xf32>
    %cst_7 = arith.constant 0.00999999977 : f32
    %9 = vector.broadcast %cst_7 : f32 to vector<8x256xf32>
    %10 = arith.mulf %9, %6 : vector<8x256xf32>
    %11 = arith.select %8, %6, %10 : vector<8x256xi1>, vector<8x256xf32>
    %c0_8 = arith.constant 0 : index
    %c0_9 = arith.constant 0 : index
    %c0_10 = arith.constant 0 : index
    %12 = vector.load %arg5[%c0_8, %c0_9, %c0_10] : memref<1x8x256xf32, #tpu.memory_space<vmem>>, vector<1x8x256xf32>
    %13 = vector.shape_cast %12 : vector<1x8x256xf32> to vector<8x256xf32>
    %14 = vector.shape_cast %11 : vector<8x256xf32> to vector<1x8x256xf32>
    tpu.vector_store %arg5[%c0_8, %c0_9, %c0_10], %14 {strides = array<i32>} : memref<1x8x256xf32, #tpu.memory_space<vmem>>, vector<1x8x256xf32>,
    return
  }
  func.func @transform_0(%arg0: i32, %arg1: i32) -> (i32, i32, i32) {
    %c0_i32 = arith.constant 0 : i32
    %c0_i32_0 = arith.constant 0 : i32
    return %arg0, %c0_i32, %arg1 : i32, i32, i32
  }
  func.func @transform_1(%arg0: i32, %arg1: i32) -> (i32, i32) {
    %c0_i32 = arith.constant 0 : i32
    %c0_i32_0 = arith.constant 0 : i32
    %c0_i32_1 = arith.constant 0 : i32
    return %c0_i32, %c0_i32_0 : i32, i32
  }
  func.func @transform_2(%arg0: i32, %arg1: i32) -> (i32, i32) {
    %c0_i32 = arith.constant 0 : i32
    %c0_i32_0 = arith.constant 0 : i32
    %c0_i32_1 = arith.constant 0 : i32
    return %c0_i32, %c0_i32_0 : i32, i32
  }
  func.func @transform_3(%arg0: i32, %arg1: i32) -> (i32, i32, i32) {
    %c0_i32 = arith.constant 0 : i32
    %c0_i32_0 = arith.constant 0 : i32
    return %arg0, %c0_i32, %arg1 : i32, i32, i32
  }
}

</mosaic_0001>

<bundles_post_ra>
// kernel: conv_block_forward.1
= control target key start
LH: loop header
LB: loop body
LE: loop exit
PB: predicated region body
PF: predicated region fallthrough
CT: control target
= control target key end

     0   :  { %s494_s12 = smov 0   ;;  %s496_s13 = smov 0   ;;  %s533_s0 = inlined_call_operand.vmem [shape: bf16[2,36,256], index: 0, kind: input, shape index: {}]   ;;  %s534_s1 = inlined_call_operand.vmem [shape: bf16[8,36], index: 1, kind: input, shape index: {}]   ;;  %s535_s2 = inlined_call_operand.vmem [shape: f32[8,1], index: 2, kind: input, shape index: {}]   ;;  %s536_s3 = inlined_call_operand.vmem [shape: f32[2,8,256], index: 3, kind: output, shape index: {}]  }
   0x1   :  { %s498_s14 = smov 0  }
   0x2 LB: > { %s25_s15 = sadd.s32 1, %s467_s13  ;;  %p399_p0 = scmp.ge.s32.totalorder %s471_s14, 1  ;;  %s471_s14 = sphi %s498_s14, %s13_s14   ;;  %s467_s13 = sphi %s496_s13, %s538_s13   ;;  %s463_s12 = sphi %s494_s12, %s537_s12  }
   0x3   : > { %p27_p1 = scmp.ge.s32.totalorder %s25_s15, 2  ;;  %p158_p2 = scmp.lt.s32.totalorder %s471_s14, 3 }
   0x5   : > { %s540_s15 = smov (%p27_p1, %s25_s15), 0  ;;  %p159_p3 = pnand %p399_p0, %p158_p2 }
   0x6   : > { %p191_p4 = scmp.lt.s32.totalorder (!%p159_p3), %s463_s12, 1 }
   0x7   : > { %162 = sbr.rel (%p159_p3) target bundleno = 232 (0xe8), region = 32 }
   0xc   : > { %v473_v0 = vmov 0   ;;  %v217_v1 = vld [vmem:[%s535_s2] sm:$0xff]  ;;  %s542_s12 = smov (!%p191_p4, %s463_s12), 1  ;;  %vm252_vm0 = vcmask 1041408   ;;  %vm248_vm1 = vcmask 293888  }
   0xd   : > { %291 = vmatprep.mubr.bf16.mxu0 %v473_v0  ;;  %440 = vset.pattern.permute.xlu0 %v473_v0  ;;  %s414_s18 = smul.u32 40, %s542_s12  ;;  %v211_v10 = vld [vmem:[%s534_s1] sm:$0xf]  ;;  %s413_s24 = sshll.u32 %s542_s12, 4 }
   0xe   : > { %220 = vperm.xlu0 %440, %v217_v1   ;;  %s208_s27 = scalar_lea.vmem %s536_s3, %s413_s24 }
   0xf   : > { %s198_s21 = scalar_lea.vmem %s533_s0, %s414_s18 }
  0x10   : > { %v216_v2 = vld [vmem:[%s198_s21 + $0x20] sm:$0x33]  ;;  %v443_v5 = vld [vmem:[%s198_s21 + $0x14] ss:$8 sps:$4 sm:$0xff]   ;;  %v445_v7 = vld [vmem:[%s198_s21 + $0x10] ss:$8 sps:$4 sm:$0xff]  }
  0x11   : > { %v408_v3 = vcombine.high %v216_v2, %v216_v2  ;;  %v407_v4 = vcombine.low %v216_v2, %v216_v2  ;;  %v446_v8 = vld [vmem:[%s198_s21 + $0x4] ss:$8 sps:$4 sm:$0xff]   ;;  %v448_v9 = vld [vmem:[%s198_s21] ss:$8 sps:$4 sm:$0xff]  }
  0x13   : > { %409 = vmatprep.subr.msk.bf16.mxu0 %vm252_vm0, %v408_v3  ;;  %v254_v6 = vsel %vm252_vm0, %v407_v4, 0 }
  0x14   : > { %270 = vmatpush1.bf16.msra.mxu0 %v254_v6 }
  0x15   : > { %271 = vmatprep.subr.bf16.mxu0 %v443_v5 }
  0x18   : > { %272 = vmatpush1.bf16.msra.mxu0 %v445_v7 }
  0x19   : > { %273 = vmatprep.subr.bf16.mxu0 %v446_v8 }
  0x1c   : > { %274 = vmatpush1.bf16.msra.mxu0 %v448_v9 }
  0x1f   : > { %410 = vmatmul.mubr.msk.bf16.vlgmr.msra.gmra.mxu0 %vm248_vm1, %v211_v10 }
  0x89   : > { %v221_v11 = vpop.permute.xlu0 %220 }
  0xdf   : > { %v293_v12 = vpop.f32.mrf.mxu0 }
  0xe0   : > { %v294_v13 = vadd.f32 %v293_v12, %v221_v11 }
  0xe1   : > { %v295_v14 = vpop.f32.mrf.mxu0 }
  0xe2   : > { %vm300_vm2 = vcmp.gt.f32.partialorder %v294_v13, 0.0  ;;  %v302_v15 = vmul.f32 0.01, %v294_v13  ;;  %v296_v16 = vadd.f32 %v295_v14, %v221_v11 }
  0xe3   : > { %v297_v17 = vpop.f32.mrf.mxu0 }
  0xe4   : > { %v304_v18 = vsel %vm300_vm2, %v294_v13, %v302_v15  ;;  %vm301_vm3 = vcmp.gt.f32.partialorder %v296_v16, 0.0  ;;  %v303_v19 = vmul.f32 0.01, %v296_v16 }
  0xe5   : > { %306 = vst [vmem:[%s208_s27] sm:$0xff] %v304_v18  ;;  %v298_v20 = vpop.f32.mrf.mxu0 }
  0xe6   : > { %v305_v21 = vsel %vm301_vm3, %v296_v16, %v303_v19 }
  0xe7   : > { %307 = vst [vmem:[%s208_s27 + $0x8] sm:$0xff] %v305_v21 }
  0xe8 PF: > { %s13_s14 = sadd.s32 1, %s471_s14   ;;  %s537_s12 = smov %s467_s13 }
  0xe9   : > { %p10_p5 = scmp.ge.s32.totalorder %s13_s14, 4   ;;  %s538_s13 = smov %s540_s15 }
  0xeb   :  { %12 = sbr.rel (!%p10_p5) target bundleno = 2 (0x2), region = 62 }

</bundles_post_ra>
